<compile_context>
chip_gen: v5e
topology: v5e:2x2
jax: 0.10.0
libtpu: 0.0.40
codegen_flags: <defaults>
</compile_context>

<pallas_src>
import math

import jax
import jax.numpy as jnp
from jax.experimental import pallas as pl
from jax.experimental.pallas import tpu as pltpu


def s4d_stack_kernel(x_ref, mask_ref, ln_g_ref, ln_b_ref, kssm_ref, dskip_ref,
                     w_ref, b_ref, seq_ref, glob_ref, hpad_ref):
    """One (batch tile, layer) grid step of the S4D stack.

    x_ref    : (Nb*S, D)     flattened input rows for this batch tile
    mask_ref : (Nb*S, 1)     float mask rows
    ln_g/b   : (1, D)        this layer's LayerNorm affine params
    kssm_ref : (S, D)        this layer's SSM kernel, one row per lag tau
    dskip_ref: (1, D)        this layer's skip ("D") parameter
    w_ref    : (D, 2D)       fused GLU pointwise weights (bf16)
    b_ref    : (1, 2D)       fused GLU bias (f32)
    seq_ref  : (Nb*S, D)     output sequence; also the state carried across layers
    glob_ref : (Nb, D)       masked-mean pooled global state (written at last layer)
    hpad_ref : (S+Nb*S, D)   VMEM scratch: S zero rows + h, for causal shifts
    """
    layer = pl.program_id(1)
    num_layers = pl.num_programs(1)
    rows, d = seq_ref.shape
    s = kssm_ref.shape[0]
    nb = rows // s

    m = mask_ref[...]                                          # (rows, 1)

    # Layer 0: seed the carried state (resident output block) from the input.
    @pl.when(layer == 0)
    def _():
        seq_ref[...] = x_ref[...]

    state = seq_ref[...]                                       # (rows, D) f32
    xm = state * m

    # ---- LayerNorm over D: single-pass statistics (two independent lane reductions) ----
    mu = jnp.mean(xm, axis=-1, keepdims=True)
    ex2 = jnp.mean(xm * xm, axis=-1, keepdims=True)
    var = jnp.maximum(ex2 - mu * mu, 0.0)
    h = (xm - mu) * jax.lax.rsqrt(var + 1e-5)
    h = h * ln_g_ref[...] + ln_b_ref[...]

    # ---- causal depthwise SSM conv: y[t] = sum_tau K[tau] * h[t - tau] ----
    # Zero-padded staging buffer so a single dynamic sublane slice realises the
    # shift; cross-batch leakage of the flat layout is removed by the `pos` mask.
    hpad_ref[pl.ds(0, s), :] = jnp.zeros((s, d), jnp.float32)
    hpad_ref[pl.ds(s, rows), :] = h
    pos = jax.lax.broadcasted_iota(jnp.int32, (rows, 1), 0) % s   # within-sequence position

    def conv_body(tau, acc):
        k_tau = kssm_ref[pl.ds(tau, 1), :]                     # (1, D)   lag-tau kernel row
        h_shift = hpad_ref[pl.ds(s - tau, rows), :]            # (rows, D) h shifted down by tau
        valid = (pos >= tau).astype(jnp.float32)               # causal / batch-boundary mask
        return acc + (k_tau * h_shift) * valid

    y = jax.lax.fori_loop(0, s, conv_body, jnp.zeros_like(h))
    y = y + h * dskip_ref[...]                                 # "D * u" skip path

    # ---- GELU (tanh approximation) ----
    # TODO(synk): torch nn.GELU default is the exact erf form.
    y = jax.nn.gelu(y, approximate=True)

    # ---- fused GLU pointwise projection: one (Nb*S, D) x (D, 2D) MXU matmul,
    #      bf16 operands with f32 accumulation; elementwise math stays f32 ----
    z = jnp.dot(y.astype(jnp.bfloat16), w_ref[...],
                preferred_element_type=jnp.float32) + b_ref[...]
    out = z[:, :d] * jax.nn.sigmoid(z[:, d:])

    new_state = xm + out
    seq_ref[...] = new_state                                   # carried to next layer

    # ---- finalize: masked mean pooling, written as one lane-dense slab ----
    @pl.when(layer == num_layers - 1)
    def _():
        ones_d = jnp.ones((1, d), jnp.float32)
        num = jnp.sum((new_state * m).reshape(nb, s, d), axis=1)   # (Nb, D)
        den = jnp.sum((m * ones_d).reshape(nb, s, d), axis=1)      # (Nb, D)
        glob_ref[...] = num / den                                  # matches reference (NaN if fully padded)


def s4d_stack_forward(x, input_mask, params, *, batch_tile=None):
    """JAX wrapper mirroring S4DStack.forward."""
    n, s, d = x.shape
    num_layers = params['kssm'].shape[0]
    nb = n if batch_tile is None else batch_tile
    assert n % nb == 0, "batch tile must divide batch"

    # Flatten (N, S, D) -> (N*S, D): everything in the kernel is a lane-dense
    # 2-D (sublane, lane) slab; no per-sequence row writes.
    x2 = x.reshape(n * s, d).astype(jnp.float32)
    mask2 = input_mask.reshape(n * s, 1).astype(jnp.float32)

    grid = (n // nb, num_layers)

    seq2, glob = pl.pallas_call(
        s4d_stack_kernel,
        out_shape=(jax.ShapeDtypeStruct((n * s, d), jnp.float32),
                   jax.ShapeDtypeStruct((n, d), jnp.float32)),
        grid=grid,
        in_specs=[
            pl.BlockSpec((nb * s, d), lambda b, l: (b, 0)),         # x (only read at l==0)
            pl.BlockSpec((nb * s, 1), lambda b, l: (b, 0)),         # mask
            pl.BlockSpec((None, 1, d), lambda b, l: (l, 0, 0)),     # ln gamma
            pl.BlockSpec((None, 1, d), lambda b, l: (l, 0, 0)),     # ln beta
            pl.BlockSpec((None, s, d), lambda b, l: (l, 0, 0)),     # SSM kernel rows (per lag)
            pl.BlockSpec((None, 1, d), lambda b, l: (l, 0, 0)),     # D-skip
            pl.BlockSpec((None, d, 2 * d), lambda b, l: (l, 0, 0)), # fused GLU weight (bf16)
            pl.BlockSpec((None, 1, 2 * d), lambda b, l: (l, 0, 0)), # fused GLU bias
        ],
        out_specs=(
            pl.BlockSpec((nb * s, d), lambda b, l: (b, 0)),         # sequence / carried state
            pl.BlockSpec((nb, d), lambda b, l: (b, 0)),             # global state
        ),
        scratch_shapes=[pltpu.VMEM((s + nb * s, d), jnp.float32)],  # zero-padded h staging
        compiler_params=pltpu.CompilerParams(
            # batch tiles shard across TCs (v7x megacore); layer axis carries state.
            dimension_semantics=("parallel", "arbitrary"),
            # Explicit, conservative scoped-VMEM cap (safe on v5e/v6e/v7x); at larger
            # shapes size nb so (one layer's params + batch tile) * 2 buffers fits.
            vmem_limit_bytes=32 * 1024 * 1024,
        ),
    )(x2, mask2, params['ln_g'], params['ln_b'], params['kssm'],
      params['dskip'], params['w'], params['b'])

    return {'sequence': seq2.reshape(n, s, d), 'global_state': glob,
            'input_mask': input_mask, 'aux_loss': None}


def s4d_stack_reference(x, input_mask, params):
    """Pure-JAX reference (same assumed block) for correctness checking."""
    n, s, d = x.shape
    m = input_mask.reshape(n, s, 1).astype(jnp.float32)
    state = x.astype(jnp.float32)
    for l in range(params['kssm'].shape[0]):
        xm = state * m
        mu = jnp.mean(xm, axis=-1, keepdims=True)
        var = jnp.maximum(jnp.mean(xm * xm, axis=-1, keepdims=True) - mu * mu, 0.0)
        h = (xm - mu) * jax.lax.rsqrt(var + 1e-5)
        h = h * params['ln_g'][l] + params['ln_b'][l]
        k = params['kssm'][l]                                      # (S, D)
        y = jnp.zeros_like(h)
        for tau in range(s):                                       # same lag-sum order as kernel
            shifted = jnp.pad(h, ((0, 0), (tau, 0), (0, 0)))[:, :s, :]
            y = y + k[tau][None, None, :] * shifted
        y = y + h * params['dskip'][l]
        y = jax.nn.gelu(y, approximate=True)
        w32 = params['w'][l].astype(jnp.float32)
        z = jnp.matmul(y.astype(jnp.bfloat16).astype(jnp.float32), w32,
                       precision=jax.lax.Precision.HIGHEST) + params['b'][l]
        out = z[..., :d] * jax.nn.sigmoid(z[..., d:])
        state = xm + out
    num = jnp.sum(state * m, axis=1)
    den = jnp.sum(m, axis=1)
    return state, num / den


def init_params(key, d_model, n_layers, seq_len, d_state=16):
    """Deterministic parameter init following the minimal S4D recipe."""
    dt_min, dt_max = 1e-3, 1e-1
    n2 = d_state // 2

    ln_g, ln_b, ks, dskips, ws, bs = ([] for _ in range(6))
    for _ in range(n_layers):
        key, k0, k1, k2, k3, k4, k5 = jax.random.split(key, 7)
        log_dt = (jax.random.uniform(k0, (d_model,))
                  * (math.log(dt_max) - math.log(dt_min)) + math.log(dt_min))
        c = (jax.random.normal(k1, (d_model, n2)) * (0.5 ** 0.5)
             + 1j * jax.random.normal(k2, (d_model, n2)) * (0.5 ** 0.5))
        log_a_real = jnp.log(0.5 * jnp.ones((d_model, n2)))
        a_imag = math.pi * jnp.broadcast_to(
            jnp.arange(n2, dtype=jnp.float32), (d_model, n2))

        # Discretized diagonal SSM convolution kernel K[d, l] (Vandermonde).
        dt = jnp.exp(log_dt)
        a = -jnp.exp(log_a_real) + 1j * a_imag
        dt_a = a * dt[:, None]
        c_disc = c * (jnp.exp(dt_a) - 1.0) / a
        steps = jnp.arange(seq_len, dtype=jnp.float32)
        vand = jnp.exp(dt_a[:, :, None] * steps[None, None, :])          # (D, n2, S)
        k_ssm = 2.0 * jnp.real(jnp.einsum('dn,dnl->dl', c_disc, vand))   # (D, S)

        d_skip = jax.random.normal(k3, (d_model,))
        bound = 1.0 / math.sqrt(d_model)
        w = jax.random.uniform(k4, (2 * d_model, d_model), minval=-bound, maxval=bound)
        b = jax.random.uniform(k5, (2 * d_model,), minval=-bound, maxval=bound)

        ln_g.append(jnp.ones((1, d_model), jnp.float32))
        ln_b.append(jnp.zeros((1, d_model), jnp.float32))
        ks.append(k_ssm.T.astype(jnp.float32))                           # (S, D): row = lag tau
        dskips.append(d_skip.reshape(1, d_model).astype(jnp.float32))
        ws.append(w.T.astype(jnp.float32))                               # (D, 2D) fused GLU
        bs.append(b.reshape(1, 2 * d_model).astype(jnp.float32))

    return dict(ln_g=jnp.stack(ln_g), ln_b=jnp.stack(ln_b), kssm=jnp.stack(ks),
                dskip=jnp.stack(dskips),
                w=jnp.stack(ws).astype(jnp.bfloat16),   # MXU-only operand: bf16 halves DMA bytes
                b=jnp.stack(bs))


if __name__ == "__main__":
    config = {'hidden_size': 32, 'layers': 2, 'd_state': 16}
    N, S, D = 2, 16, config['hidden_size']

    key = jax.random.PRNGKey(0)
    kx, kp = jax.random.split(key)
    x = jax.random.normal(kx, (N, S, D), dtype=jnp.float32)
    lengths = jnp.array([S, 11])
    input_mask = (jnp.arange(S)[None, :] < lengths[:, None]).astype(jnp.float32)   # (N, S)

    params = init_params(kp, D, config['layers'], S, config['d_state'])

    out = s4d_stack_forward(x, input_mask, params)
    jax.block_until_ready(out['sequence'])
    jax.block_until_ready(out['global_state'])

    assert out['sequence'].shape == (N, S, D)
    assert out['global_state'].shape == (N, D)
    assert out['aux_loss'] is None

    # Correctness check against a pure-JAX reference of the same assumed block.
    seq_ref, glob_ref = s4d_stack_reference(x, input_mask, params)
    seq_err = float(jnp.max(jnp.abs(out['sequence'] - seq_ref)))
    glob_err = float(jnp.max(jnp.abs(out['global_state'] - glob_ref)))
    assert seq_err < 1e-2 and glob_err < 1e-2, (seq_err, glob_err)

    print("KERNEL_OK")
</pallas_src>

<mosaic_0001>
module attributes {stable_mosaic.version = 11 : i64} {
  func.func @s4d_stack_kernel(%arg0: i32, %arg1: i32, %arg2: memref<32x32xf32, #tpu.memory_space<vmem>>, %arg3: memref<32x1xf32, #tpu.memory_space<vmem>>, %arg4: memref<1x1x32xf32, #tpu.memory_space<vmem>>, %arg5: memref<1x1x32xf32, #tpu.memory_space<vmem>>, %arg6: memref<1x16x32xf32, #tpu.memory_space<vmem>>, %arg7: memref<1x1x32xf32, #tpu.memory_space<vmem>>, %arg8: memref<1x32x64xbf16, #tpu.memory_space<vmem>>, %arg9: memref<1x1x64xf32, #tpu.memory_space<vmem>>, %arg10: memref<32x32xf32, #tpu.memory_space<vmem>>, %arg11: memref<2x32xf32, #tpu.memory_space<vmem>>, %arg12: memref<48x32xf32, #tpu.memory_space<vmem>>) attributes {dimension_semantics = [#tpu.dimension_semantics<parallel>, #tpu.dimension_semantics<arbitrary>], iteration_bounds = array<i64: 1, 2>, scalar_prefetch = 0 : i64, scratch_operands = 1 : i64, tpu.core_type = #tpu.core_type<tc>, window_params = [{transform_indices = @transform_0, window_bounds = array<i64: 32, 32>}, {transform_indices = @transform_1, window_bounds = array<i64: 32, 1>}, {transform_indices = @transform_2, window_bounds = array<i64: 1, 1, 32>}, {transform_indices = @transform_3, window_bounds = array<i64: 1, 1, 32>}, {transform_indices = @transform_4, window_bounds = array<i64: 1, 16, 32>}, {transform_indices = @transform_5, window_bounds = array<i64: 1, 1, 32>}, {transform_indices = @transform_6, window_bounds = array<i64: 1, 32, 64>}, {transform_indices = @transform_7, window_bounds = array<i64: 1, 1, 64>}, {transform_indices = @transform_8, window_bounds = array<i64: 32, 32>}, {transform_indices = @transform_9, window_bounds = array<i64: 2, 32>}]} {
    %c0 = arith.constant 0 : index
    %c0_0 = arith.constant 0 : index
    %0 = vector.load %arg3[%c0, %c0_0] : memref<32x1xf32, #tpu.memory_space<vmem>>, vector<32x1xf32>
    %c0_i32 = arith.constant 0 : i32
    %1 = arith.cmpi eq, %arg1, %c0_i32 : i32
    %2 = arith.extui %1 : i1 to i32
    %c0_i32_1 = arith.constant 0 : i32
    %3 = arith.cmpi ne, %2, %c0_i32_1 : i32
    scf.if %3 {
      %c0_47 = arith.constant 0 : index
      %c0_48 = arith.constant 0 : index
      %97 = vector.load %arg2[%c0_47, %c0_48] : memref<32x32xf32, #tpu.memory_space<vmem>>, vector<32x32xf32>
      %c0_49 = arith.constant 0 : index
      %c0_50 = arith.constant 0 : index
      %98 = vector.load %arg10[%c0_49, %c0_50] : memref<32x32xf32, #tpu.memory_space<vmem>>, vector<32x32xf32>
      tpu.vector_store %arg10[%c0_49, %c0_50], %97 {strides = array<i32>} : memref<32x32xf32, #tpu.memory_space<vmem>>, vector<32x32xf32>,
    } else {
    }
    %c0_2 = arith.constant 0 : index
    %c0_3 = arith.constant 0 : index
    %4 = vector.load %arg10[%c0_2, %c0_3] : memref<32x32xf32, #tpu.memory_space<vmem>>, vector<32x32xf32>
    %5 = vector.broadcast %0 : vector<32x1xf32> to vector<32x32xf32>
    %6 = arith.mulf %4, %5 : vector<32x32xf32>
    %cst = arith.constant dense<0.000000e+00> : vector<32xf32>
    %7 = vector.multi_reduction <add>, %6, %cst [1] : vector<32x32xf32> to vector<32xf32>
    %8 = vector.shape_cast %7 : vector<32xf32> to vector<32x1xf32>
    %cst_4 = arith.constant 3.200000e+01 : f32
    %9 = vector.broadcast %cst_4 : f32 to vector<32x1xf32>
    %10 = arith.divf %8, %9 : vector<32x1xf32>
    %11 = arith.mulf %6, %6 : vector<32x32xf32>
    %cst_5 = arith.constant dense<0.000000e+00> : vector<32xf32>
    %12 = vector.multi_reduction <add>, %11, %cst_5 [1] : vector<32x32xf32> to vector<32xf32>
    %13 = vector.shape_cast %12 : vector<32xf32> to vector<32x1xf32>
    %cst_6 = arith.constant 3.200000e+01 : f32
    %14 = vector.broadcast %cst_6 : f32 to vector<32x1xf32>
    %15 = arith.divf %13, %14 : vector<32x1xf32>
    %16 = arith.mulf %10, %10 : vector<32x1xf32>
    %17 = arith.subf %15, %16 : vector<32x1xf32>
    %cst_7 = arith.constant 0.000000e+00 : f32
    %18 = vector.broadcast %cst_7 : f32 to vector<32x1xf32>
    %19 = arith.maximumf %17, %18 : vector<32x1xf32>
    %20 = vector.broadcast %10 : vector<32x1xf32> to vector<32x32xf32>
    %21 = arith.subf %6, %20 : vector<32x32xf32>
    %cst_8 = arith.constant 9.99999974E-6 : f32
    %22 = vector.broadcast %cst_8 : f32 to vector<32x1xf32>
    %23 = arith.addf %19, %22 : vector<32x1xf32>
    %24 = math.rsqrt %23 : vector<32x1xf32>
    %25 = vector.broadcast %24 : vector<32x1xf32> to vector<32x32xf32>
    %26 = arith.mulf %21, %25 : vector<32x32xf32>
    %c0_9 = arith.constant 0 : index
    %c0_10 = arith.constant 0 : index
    %c0_11 = arith.constant 0 : index
    %27 = vector.load %arg4[%c0_9, %c0_10, %c0_11] : memref<1x1x32xf32, #tpu.memory_space<vmem>>, vector<1x1x32xf32>
    %28 = vector.shape_cast %27 : vector<1x1x32xf32> to vector<1x32xf32>
    %29 = vector.broadcast %28 : vector<1x32xf32> to vector<32x32xf32>
    %30 = arith.mulf %26, %29 : vector<32x32xf32>
    %c0_12 = arith.constant 0 : index
    %c0_13 = arith.constant 0 : index
    %c0_14 = arith.constant 0 : index
    %31 = vector.load %arg5[%c0_12, %c0_13, %c0_14] : memref<1x1x32xf32, #tpu.memory_space<vmem>>, vector<1x1x32xf32>
    %32 = vector.shape_cast %31 : vector<1x1x32xf32> to vector<1x32xf32>
    %33 = vector.broadcast %32 : vector<1x32xf32> to vector<32x32xf32>
    %34 = arith.addf %30, %33 : vector<32x32xf32>
    %cst_15 = arith.constant 0.000000e+00 : f32
    %35 = vector.broadcast %cst_15 : f32 to vector<16x32xf32>
    %c0_16 = arith.constant 0 : index
    %c0_17 = arith.constant 0 : index
    %36 = vector.load %arg12[%c0_16, %c0_17] : memref<48x32xf32, #tpu.memory_space<vmem>>, vector<16x32xf32>
    tpu.vector_store %arg12[%c0_16, %c0_17], %35 {strides = array<i32>} : memref<48x32xf32, #tpu.memory_space<vmem>>, vector<16x32xf32>,
    %c16 = arith.constant 16 : index
    %c0_18 = arith.constant 0 : index
    %37 = vector.load %arg12[%c16, %c0_18] : memref<48x32xf32, #tpu.memory_space<vmem>>, vector<32x32xf32>
    tpu.vector_store %arg12[%c16, %c0_18], %34 {strides = array<i32>} : memref<48x32xf32, #tpu.memory_space<vmem>>, vector<32x32xf32>,
    %38 = tpu.iota {dimensions = array<i32: 0>} : vector<32x1xi32>
    %c16_i32 = arith.constant 16 : i32
    %c0_i32_19 = arith.constant 0 : i32
    %39 = arith.cmpi eq, %c16_i32, %c0_i32_19 : i32
    %c1_i32 = arith.constant 1 : i32
    %40 = arith.select %39, %c1_i32, %c16_i32 : i32
    %41 = vector.broadcast %40 : i32 to vector<32x1xi32>
    %42 = arith.remsi %38, %41 : vector<32x1xi32>
    %c0_i32_20 = arith.constant 0 : i32
    %43 = vector.broadcast %c0_i32_20 : i32 to vector<32x1xi32>
    %44 = arith.cmpi ne, %42, %43 : vector<32x1xi32>
    %c0_i32_21 = arith.constant 0 : i32
    %45 = vector.broadcast %c0_i32_21 : i32 to vector<32x1xi32>
    %46 = arith.cmpi slt, %42, %45 : vector<32x1xi32>
    %c0_i32_22 = arith.constant 0 : i32
    %47 = arith.cmpi slt, %40, %c0_i32_22 : i32
    %48 = vector.broadcast %47 : i1 to vector<32x1xi1>
    %49 = vector.broadcast %48 : vector<32x1xi1> to vector<32x1xi1>
    %50 = arith.xori %46, %49 : vector<32x1xi1>
    %51 = arith.andi %50, %44 : vector<32x1xi1>
    %52 = vector.broadcast %40 : i32 to vector<32x1xi32>
    %53 = arith.addi %42, %52 : vector<32x1xi32>
    %54 = arith.select %51, %53, %42 : vector<32x1xi1>, vector<32x1xi32>
    %cst_23 = arith.constant 0.000000e+00 : f32
    %55 = vector.broadcast %cst_23 : f32 to vector<32x32xf32>
    %c0_i32_24 = arith.constant 0 : i32
    %c16_i32_25 = arith.constant 16 : i32
    %56 = arith.addi %c0_i32_24, %c16_i32_25 : i32
    %c1_i32_26 = arith.constant 1 : i32
    %57 = scf.for %arg13 = %c0_i32_24 to %56 step %c1_i32_26 iter_args(%arg14 = %55) -> (vector<32x32xf32>)  : i32 {
      %c0_47 = arith.constant 0 : index
      %97 = arith.index_cast %arg13 : i32 to index
      %c0_48 = arith.constant 0 : index
      %98 = vector.load %arg6[%c0_47, %97, %c0_48] : memref<1x16x32xf32, #tpu.memory_space<vmem>>, vector<1x1x32xf32>
      %99 = vector.shape_cast %98 : vector<1x1x32xf32> to vector<1x32xf32>
      %c16_i32_49 = arith.constant 16 : i32
      %100 = arith.subi %c16_i32_49, %arg13 : i32
      %101 = arith.index_cast %100 : i32 to index
      %c0_50 = arith.constant 0 : index
      %102 = vector.load %arg12[%101, %c0_50] : memref<48x32xf32, #tpu.memory_space<vmem>>, vector<32x32xf32>
      %103 = vector.broadcast %arg13 : i32 to vector<32x1xi32>
      %104 = arith.cmpi sge, %54, %103 : vector<32x1xi32>
      %105 = arith.extui %104 : vector<32x1xi1> to vector<32x1xi32>
      %106 = arith.sitofp %105 : vector<32x1xi32> to vector<32x1xf32>
      %107 = vector.broadcast %99 : vector<1x32xf32> to vector<32x32xf32>
      %108 = arith.mulf %107, %102 : vector<32x32xf32>
      %109 = vector.broadcast %106 : vector<32x1xf32> to vector<32x32xf32>
      %110 = arith.mulf %108, %109 : vector<32x32xf32>
      %111 = arith.addf %arg14, %110 : vector<32x32xf32>
      scf.yield %111 : vector<32x32xf32>
    }
    %c16_i32_27 = arith.constant 16 : i32
    %c0_28 = arith.constant 0 : index
    %c0_29 = arith.constant 0 : index
    %c0_30 = arith.constant 0 : index
    %58 = vector.load %arg7[%c0_28, %c0_29, %c0_30] : memref<1x1x32xf32, #tpu.memory_space<vmem>>, vector<1x1x32xf32>
    %59 = vector.shape_cast %58 : vector<1x1x32xf32> to vector<1x32xf32>
    %60 = vector.broadcast %59 : vector<1x32xf32> to vector<32x32xf32>
    %61 = arith.mulf %34, %60 : vector<32x32xf32>
    %62 = arith.addf %57, %61 : vector<32x32xf32>
    %63 = arith.mulf %62, %62 : vector<32x32xf32>
    %64 = arith.mulf %62, %63 : vector<32x32xf32>
    %cst_31 = arith.constant 4.471500e-02 : f32
    %65 = vector.broadcast %cst_31 : f32 to vector<32x32xf32>
    %66 = arith.mulf %65, %64 : vector<32x32xf32>
    %67 = arith.addf %62, %66 : vector<32x32xf32>
    %cst_32 = arith.constant 0.797884583 : f32
    %68 = vector.broadcast %cst_32 : f32 to vector<32x32xf32>
    %69 = arith.mulf %68, %67 : vector<32x32xf32>
    %70 = math.tanh %69 : vector<32x32xf32>
    %cst_33 = arith.constant 1.000000e+00 : f32
    %71 = vector.broadcast %cst_33 : f32 to vector<32x32xf32>
    %72 = arith.addf %71, %70 : vector<32x32xf32>
    %cst_34 = arith.constant 5.000000e-01 : f32
    %73 = vector.broadcast %cst_34 : f32 to vector<32x32xf32>
    %74 = arith.mulf %73, %72 : vector<32x32xf32>
    %75 = arith.mulf %62, %74 : vector<32x32xf32>
    %76 = arith.truncf %75 : vector<32x32xf32> to vector<32x32xbf16>
    %c0_35 = arith.constant 0 : index
    %c0_36 = arith.constant 0 : index
    %c0_37 = arith.constant 0 : index
    %77 = vector.load %arg8[%c0_35, %c0_36, %c0_37] : memref<1x32x64xbf16, #tpu.memory_space<vmem>>, vector<1x32x64xbf16>
    %78 = vector.shape_cast %77 : vector<1x32x64xbf16> to vector<32x64xbf16>
    %cst_38 = arith.constant dense<0.000000e+00> : vector<32x64xf32>
    %79 = tpu.matmul %76, %78, %cst_38 {dimension_numbers = #tpu.dot_dimension_numbers<[1], [0], [0], [1], [0, 0, 1, 1], [], []>} : vector<32x32xbf16>, vector<32x64xbf16>, vector<32x64xf32> -> vector<32x64xf32>
    %c0_39 = arith.constant 0 : index
    %c0_40 = arith.constant 0 : index
    %c0_41 = arith.constant 0 : index
    %80 = vector.load %arg9[%c0_39, %c0_40, %c0_41] : memref<1x1x64xf32, #tpu.memory_space<vmem>>, vector<1x1x64xf32>
    %81 = vector.shape_cast %80 : vector<1x1x64xf32> to vector<1x64xf32>
    %82 = vector.broadcast %81 : vector<1x64xf32> to vector<32x64xf32>
    %83 = arith.addf %79, %82 : vector<32x64xf32>
    %84 = vector.extract_strided_slice %83 {offsets = [0, 0], sizes = [32, 32], strides = [1, 1]} : vector<32x64xf32> to vector<32x32xf32>
    %85 = vector.extract_strided_slice %83 {offsets = [0, 32], sizes = [32, 32], strides = [1, 1]} : vector<32x64xf32> to vector<32x32xf32>
    %86 = arith.negf %85 : vector<32x32xf32>
    %87 = math.exp %86 : vector<32x32xf32>
    %cst_42 = arith.constant 1.000000e+00 : f32
    %88 = vector.broadcast %cst_42 : f32 to vector<32x32xf32>
    %89 = arith.addf %88, %87 : vector<32x32xf32>
    %90 = arith.divf %88, %89 : vector<32x32xf32>
    %91 = arith.mulf %84, %90 : vector<32x32xf32>
    %92 = arith.addf %6, %91 : vector<32x32xf32>
    %c0_43 = arith.constant 0 : index
    %c0_44 = arith.constant 0 : index
    %93 = vector.load %arg10[%c0_43, %c0_44] : memref<32x32xf32, #tpu.memory_space<vmem>>, vector<32x32xf32>
    tpu.vector_store %arg10[%c0_43, %c0_44], %92 {strides = array<i32>} : memref<32x32xf32, #tpu.memory_space<vmem>>, vector<32x32xf32>,
    %c1_i32_45 = arith.constant 1 : i32
    %94 = arith.cmpi eq, %arg1, %c1_i32_45 : i32
    %95 = arith.extui %94 : i1 to i32
    %c0_i32_46 = arith.constant 0 : i32
    %96 = arith.cmpi ne, %95, %c0_i32_46 : i32
    scf.if %96 {
      %cst_47 = arith.constant 1.000000e+00 : f32
      %97 = vector.broadcast %cst_47 : f32 to vector<1x32xf32>
      %98 = vector.broadcast %0 : vector<32x1xf32> to vector<32x32xf32>
      %99 = arith.mulf %92, %98 : vector<32x32xf32>
      %100 = vector.shape_cast %99 : vector<32x32xf32> to vector<2x16x32xf32>
      %cst_48 = arith.constant dense<0.000000e+00> : vector<2x32xf32>
      %101 = vector.multi_reduction <add>, %100, %cst_48 [1] : vector<2x16x32xf32> to vector<2x32xf32>
      %102 = vector.broadcast %0 : vector<32x1xf32> to vector<32x32xf32>
      %103 = vector.broadcast %97 : vector<1x32xf32> to vector<32x32xf32>
      %104 = arith.mulf %102, %103 : vector<32x32xf32>
      %105 = vector.shape_cast %104 : vector<32x32xf32> to vector<2x16x32xf32>
      %cst_49 = arith.constant dense<0.000000e+00> : vector<2x32xf32>
      %106 = vector.multi_reduction <add>, %105, %cst_49 [1] : vector<2x16x32xf32> to vector<2x32xf32>
      %107 = arith.divf %101, %106 : vector<2x32xf32>
      %c0_50 = arith.constant 0 : index
      %c0_51 = arith.constant 0 : index
      %108 = vector.load %arg11[%c0_50, %c0_51] : memref<2x32xf32, #tpu.memory_space<vmem>>, vector<2x32xf32>
      tpu.vector_store %arg11[%c0_50, %c0_51], %107 {strides = array<i32>} : memref<2x32xf32, #tpu.memory_space<vmem>>, vector<2x32xf32>,
    } else {
    }
    return
  }
  func.func @transform_0(%arg0: i32, %arg1: i32) -> (i32, i32) {
    %c0_i32 = arith.constant 0 : i32
    %c0_i32_0 = arith.constant 0 : i32
    return %arg0, %c0_i32 : i32, i32
  }
  func.func @transform_1(%arg0: i32, %arg1: i32) -> (i32, i32) {
    %c0_i32 = arith.constant 0 : i32
    %c0_i32_0 = arith.constant 0 : i32
    return %arg0, %c0_i32 : i32, i32
  }
  func.func @transform_2(%arg0: i32, %arg1: i32) -> (i32, i32, i32) {
    %c0_i32 = arith.constant 0 : i32
    %c0_i32_0 = arith.constant 0 : i32
    %c0_i32_1 = arith.constant 0 : i32
    return %arg1, %c0_i32, %c0_i32_0 : i32, i32, i32
  }
  func.func @transform_3(%arg0: i32, %arg1: i32) -> (i32, i32, i32) {
    %c0_i32 = arith.constant 0 : i32
    %c0_i32_0 = arith.constant 0 : i32
    %c0_i32_1 = arith.constant 0 : i32
    return %arg1, %c0_i32, %c0_i32_0 : i32, i32, i32
  }
  func.func @transform_4(%arg0: i32, %arg1: i32) -> (i32, i32, i32) {
    %c0_i32 = arith.constant 0 : i32
    %c0_i32_0 = arith.constant 0 : i32
    %c0_i32_1 = arith.constant 0 : i32
    return %arg1, %c0_i32, %c0_i32_0 : i32, i32, i32
  }
  func.func @transform_5(%arg0: i32, %arg1: i32) -> (i32, i32, i32) {
    %c0_i32 = arith.constant 0 : i32
    %c0_i32_0 = arith.constant 0 : i32
    %c0_i32_1 = arith.constant 0 : i32
    return %arg1, %c0_i32, %c0_i32_0 : i32, i32, i32
  }
  func.func @transform_6(%arg0: i32, %arg1: i32) -> (i32, i32, i32) {
    %c0_i32 = arith.constant 0 : i32
    %c0_i32_0 = arith.constant 0 : i32
    %c0_i32_1 = arith.constant 0 : i32
    return %arg1, %c0_i32, %c0_i32_0 : i32, i32, i32
  }
  func.func @transform_7(%arg0: i32, %arg1: i32) -> (i32, i32, i32) {
    %c0_i32 = arith.constant 0 : i32
    %c0_i32_0 = arith.constant 0 : i32
    %c0_i32_1 = arith.constant 0 : i32
    return %arg1, %c0_i32, %c0_i32_0 : i32, i32, i32
  }
  func.func @transform_8(%arg0: i32, %arg1: i32) -> (i32, i32) {
    %c0_i32 = arith.constant 0 : i32
    %c0_i32_0 = arith.constant 0 : i32
    return %arg0, %c0_i32 : i32, i32
  }
  func.func @transform_9(%arg0: i32, %arg1: i32) -> (i32, i32) {
    %c0_i32 = arith.constant 0 : i32
    %c0_i32_0 = arith.constant 0 : i32
    return %arg0, %c0_i32 : i32, i32
  }
}

</mosaic_0001>

<bundles_post_ra>
// kernel: tpu_custom_call.1
= control target key start
LH: loop header
LB: loop body
LE: loop exit
PB: predicated region body
PF: predicated region fallthrough
CT: control target
= control target key end

     0   :  { %s2171_s0 = inlined_call_operand.vmem [shape: f32[32,32], index: 0, kind: input, shape index: {}]   ;;  %s2172_s1 = inlined_call_operand.vmem [shape: f32[32,1], index: 1, kind: input, shape index: {}]   ;;  %s2173_s2 = inlined_call_operand.vmem [shape: f32[2,1,32], index: 2, kind: input, shape index: {}]   ;;  %s2174_s3 = inlined_call_operand.hbm [shape: f32[2,1,32], index: 3, kind: input, shape index: {}]   ;;  %s2175_s4 = inlined_call_operand.hbm [shape: f32[2,16,32], index: 4, kind: input, shape index: {}]   ;;  %s2176_s5 = inlined_call_operand.vmem [shape: f32[2,1,32], index: 5, kind: input, shape index: {}]   ;;  %s2177_s6 = inlined_call_operand.hbm [shape: bf16[2,32,64], index: 6, kind: input, shape index: {}]   ;;  %s2178_s7 = inlined_call_operand.vmem [shape: f32[2,1,64], index: 7, kind: input, shape index: {}]   ;;  %s2179_s8 = inlined_call_operand.hbm [shape: f32[32,32], index: 8, kind: output, shape index: {0}]   ;;  %s2180_s9 = inlined_call_operand.hbm [shape: f32[2,32], index: 9, kind: output, shape index: {1}]  }
   0x1   :  { %2183 = sst [smem:[#allocation19_spill]] %s2175_s4 }
   0x2   :  { %2184 = sst [smem:[#allocation20_spill]] %s2179_s8 }
   0x3   :  { %2185 = sst [smem:[#allocation21_spill]] %s2180_s9 }
   0x4   :  { %15 = vsyncpa [#allocation4], 0 }
   0x5   :  { %17 = vsyncpa [#allocation4 + $0x1], 0 }
   0x6   :  { %18 = vsyncpa [#allocation7], 0 }
   0x7   :  { %20 = vsyncpa [#allocation7 + $0x1], 0 }
   0x8   :  { %21 = vsyncpa [#allocation5], 0 }
   0x9   :  { %22 = vsyncpa [#allocation11], 0  ;;  %s1824_s30 = smov 0   ;;  %s1826_s10 = smov 0  }
   0xa   :  { %s1828_s11 = smov 0   ;;  %s1830_s12 = smov 0  }
   0xb   :  { %s1832_s13 = smov 0   ;;  %s1834_s14 = smov 0  }
   0xc LB: > { %2186 = sst [smem:[#allocation16_spill]] %s1727_s11  ;;  %s1853_s15 = sadd.s32 4294967295, %s1739_s14   ;;  %s1739_s14 = sphi %s1834_s14, %s28_s14   ;;  %s1735_s13 = sphi %s1832_s13, %s2201_s13   ;;  %s1731_s12 = sphi %s1830_s12, %s2200_s12   ;;  %s1727_s11 = sphi %s1828_s11, %s2196_s11   ;;  %s1723_s10 = sphi %s1826_s10, %s2199_s10   ;;  %s1719_s30 = sphi %s1824_s30, %s2198_s30  }
   0xd   : > { %s37_s16 = sadd.s32 1, %s1735_s13  ;;  %s125_s17 = sadd.s32 1, %s1727_s11 }
   0xe   : > { %p38_p0 = scmp.ge.s32.totalorder %s37_s16, 2  ;;  %p132_p1 = scmp.ne.s32.totalorder %s1727_s11, %s1723_s10 }
   0xf   : > { %p133_p2 = scmp.eq.s32.totalorder %s1739_s14, 0  ;;  %p138_p4 = scmp.ne.s32.totalorder %s1723_s10, %s1719_s30 }
  0x10   : > { %s2203_s16 = smov (%p38_p0, %s37_s16), 0  ;;  %p139_p5 = scmp.eq.s32.totalorder %s1853_s15, 0 }
  0x11   : > { %2187 = sst [smem:[#allocation17_spill]] %s2203_s16  ;;  %p134_p3 = por %p133_p2, %p132_p1 }
  0x12   : > { %s122_s18 = ssub.s32 %s1735_s13, %s2203_s16  ;;  %p1866_p7 = por %p139_p5, %p138_p4 }
  0x13   : > { %p123_p6 = scmp.eq.s32.totalorder %s122_s18, 0  ;;  %p1360_p8 = scmp.lt.s32.totalorder %s1739_s14, 2 }
  0x14   : > { %s1875_s21 = sand.u32 1, %s1727_s11   ;;  %s359_s23 = sand.u32 1, %s1739_s14  }
  0x15   : > { %s1872_s20 = scalar_select %p123_p6, %s1727_s11, %s125_s17  }
  0x16   : > { %p1877_p9 = pnand %p1360_p8, %p134_p3  ;;  %s1295_s24 = sshll.u32 %s1875_s21, 4 }
  0x17   : > { %2189 = sst [smem:[#allocation18_spill]] %s1872_s20  ;;  %s1330_s25 = sshll.u32 %s1735_s13, 4 }
  0x18   : > { %s2191_s4 = sld [smem:[#allocation19_spill]]  ;;  %s363_s29 = scalar_lea.vmem [#allocation6], %s1295_s24 }
  0x19   : > { %s371_s30 = sshll.u32 %s363_s29, 4  ;;  %s360_s18 = scalar_lea.sflag [#allocation7], %s359_s23  ;;  %s372_s30 = int_to_ptr.vmem [resolvable:$true] %s371_s30 }
  0x1a   : > { %s1761_s16 = smov 128   ;;  %s1762_s20 = smov 8  }
  0x1b   : > { %s396_s26 = scalar_lea.hbm %s2177_s6, %s1330_s25  ;;  %s391_s27 = scalar_lea.vmem [#allocation8], %s1295_s24 }
  0x1c   : > { %s397_s8 = sshll.u32 %s396_s26, 4  ;;  %p1301_p10 = scmp.ge.s32.totalorder %s1739_s14, 1  ;;  %s398_s8 = int_to_ptr.hbm [resolvable:$true] %s397_s8 }
  0x1d   : > { %p413_p11 = scmp.lt.s32.totalorder %s1739_s14, 3  ;;  %s348_s29 = scalar_lea.hbm %s2174_s3, %s1735_s13 }
  0x1e   : > { %s368_s28 = scalar_lea.hbm %s2191_s4, %s1330_s25  ;;  %s399_s4 = sshll.u32 %s391_s27, 4  ;;  %s400_s4 = int_to_ptr.vmem [resolvable:$true] %s399_s4 }
  0x1f   : > { %s369_s17 = sshll.u32 %s368_s28, 4  ;;  %p414_p12 = pnand %p1301_p10, %p413_p11  ;;  %s370_s17 = int_to_ptr.hbm [resolvable:$true] %s369_s17 }
  0x20   : > { %1356 = dma.hbm_to_vmem [thread:$0]  (!%p1877_p9), %s370_s17, 256, %s372_s30, %s360_s18, %s1761_s16, %s1761_s16, %s1762_s20  }
  0x21   : > { %s345_s16 = scalar_lea.vmem [#allocation3], %s1875_s21  ;;  %s350_s30 = sshll.u32 %s348_s29, 4  ;;  %s351_s30 = int_to_ptr.hbm [resolvable:$true] %s350_s30 }
  0x22   : > { %s352_s20 = sshll.u32 %s345_s16, 4  ;;  %s343_s9 = scalar_lea.sflag [#allocation4], %s1875_s21  ;;  %s353_s20 = int_to_ptr.vmem [resolvable:$true] %s352_s20 }
  0x23   : > { %1353 = dma.hbm_to_vmem [thread:$0]  (!%p1877_p9), %s351_s30, 16, %s353_s20, %s343_s9  }
  0x24   : > { %s1763_s11 = smov 64   ;;  %s1764_s24 = smov 4  }
  0x25   : > { %1359 = dma.hbm_to_vmem [thread:$0]  (!%p1877_p9), %s398_s8, 256, %s400_s4, %s360_s18, %s1763_s11, %s1763_s11, %s1764_s24  }
  0x26   : > { %417 = sbr.rel (%p414_p12) target bundleno = 748 (0x2ec), region = 52  ;;  %s1905_s25 = sand.u32 (!%p414_p12), 1, %s1723_s10  }
  0x27   : > { %s420_s17 = scalar_lea.sflag (!%p414_p12), [#allocation4], %s1905_s25 }
  0x2b   : > { %1702 = dma.done.wait (%p1866_p7), %s420_s17, 16  }
  0x2c   : > { %1704 = vsyncadd (%p1866_p7), %s420_s17, 4294967280  ;;  %s428_s21 = sand.u32 1, %s1853_s15   ;;  %s1302_s22 = sshll.u32 %s1905_s25, 4 }
  0x2d   : > { %s429_s4 = scalar_lea.sflag [#allocation7], %s428_s21  ;;  %s1915_s8 = scalar_lea.vmem [#allocation6], %s1302_s22 }
  0x2e   : > { %1706 = dma.done.wait (%p1866_p7), %s429_s4, 512  }
  0x2f   : > { %1708 = vsyncadd (%p1866_p7), %s429_s4, 4294966784  ;;  %p513_p13 = scmp.lt.s32.totalorder %s1731_s12, 1  ;;  %v524_v0 = vld [vmem:[%s2172_s1] sm:$0xff]  ;;  %v525_v1 = vld [vmem:[%s2172_s1 + $0x8] sm:$0xff]  ;;  %s1949_s29 = scalar_lea.vmem [#allocation8], %s1302_s22 }
  0x30   : > { %v526_v2 = vld [vmem:[%s2172_s1 + $0x10] sm:$0xff]  ;;  %v527_v3 = vld [vmem:[%s2172_s1 + $0x18] sm:$0xff]  ;;  %p1304_p0 = scmp.ne.s32.totalorder %s1731_s12, 0 }
  0x31   : > { %s1923_s18 = scalar_select %p513_p13, %s1731_s12, 1 }
  0x32   : > { %531 = sbr.rel (%p1304_p0) target bundleno = 60 (0x3c), region = 68 }
  0x33   : > { %s515_s28 = scalar_lea.vmem %s2173_s2, %s1923_s18  ;;  %s518_s20 = scalar_lea.vmem %s2176_s5, %s1923_s18 }
  0x34   : > { %s521_s19 = scalar_lea.vmem %s2178_s7, %s1923_s18 }
  0x37   : > { %v532_v4 = vld [vmem:[%s2171_s0] sm:$0xff]  ;;  %vm536_vm0 = vcmask 261120   ;;  %v533_v5 = vld [vmem:[%s2171_s0 + $0x8] sm:$0xff]  ;;  %v534_v6 = vld [vmem:[%s2171_s0 + $0x10] sm:$0xff] }
  0x38   : > { %537 = vst.msk [vmem:[#allocation9] sm:$0xff] %vm536_vm0, %v532_v4  ;;  %v535_v7 = vld [vmem:[%s2171_s0 + $0x18] sm:$0xff] }
  0x39   : > { %538 = vst.msk [vmem:[#allocation9 + $0x8] sm:$0xff] %vm536_vm0, %v533_v5 }
  0x3a   : > { %539 = vst.msk [vmem:[#allocation9 + $0x10] sm:$0xff] %vm536_vm0, %v534_v6 }
  0x3b   : > { %540 = vst.msk [vmem:[#allocation9 + $0x18] sm:$0xff] %vm536_vm0, %v535_v7 }
  0x3c PF: > { %v1765_v8 = vmov 0   ;;  %vm569_vm1 = vcmask 261120   ;;  %v1766_v9 = vmov 0.0   ;;  %v1767_v34 = vmov 32.0   ;;  %s2192_s27 = scalar_lea.vmem [#allocation3], %s1905_s25  ;;  %s2060_s25 = smov 0  }
  0x3d   : > { %1467 = vset.pattern.permute.xlu1 %v1765_v8  ;;  %1466 = vset.pattern.permute.xlu0 %v1765_v8  ;;  %693 = vst.msk [vmem:[#allocation2] sm:$0xff] %vm569_vm1, %v1766_v9  ;;  %1470 = vrcp.f32 %v1767_v34  ;;  %v1469_v34 = vld [vmem:[%s2192_s27] ss:$0 sm:$0xff] }
  0x3e   : > { %557 = vperm.xlu1 %1467, %v526_v2   ;;  %547 = vperm.xlu0 %1466, %v524_v0   ;;  %694 = vst.msk [vmem:[#allocation2 + $0x8] sm:$0xff] %vm569_vm1, %v1766_v9 }
  0x3f   : > { %v541_v11 = vld [vmem:[#allocation9] sm:$0xff] }
  0x40   : > { %v542_v19 = vld [vmem:[#allocation9 + $0x8] sm:$0xff] }
  0x41   : > { %v543_v10 = vld [vmem:[#allocation9 + $0x10] sm:$0xff] }
  0x42   : > { %v544_v18 = vld [vmem:[#allocation9 + $0x18] sm:$0xff] }
  0x43   : > { %v1471_v35 = vpop.eup %1470 }
  0x44   : > { %v583_v36 = vmul.f32 32.0, %v1471_v35  ;;  %vm587_vm2 = vweird.f32 %v1471_v35 }
  0x46   : > { %562 = vperm.xlu1 %1467, %v527_v3   ;;  %552 = vperm.xlu0 %1466, %v525_v1   ;;  %v584_v37 = vsub.f32 1.0, %v583_v36  ;;  %v699_v3 = vlaneseq }
  0x48   : > { %v585_v39 = vmul.f32 %v1471_v35, %v584_v37  ;;  %v2014_v6 = vshrl.u32 %v699_v3, 7 }
  0x4a   : > { %v586_v40 = vadd.f32 %v1471_v35, %v585_v39 }
  0x4c   : > { %v588_v42 = vsel %vm587_vm2, %v1471_v35, %v586_v40 }
  0xb0   : > { %v1966_v12 = vpop.permute.xlu1 %557  ;;  %v1968_v13 = vpop.permute.xlu0 %547 }
  0xb1   : > { %v1971_v14 = vmul.f32 %v1966_v12, %v543_v10  ;;  %v1974_v15 = vmul.f32 %v1968_v13, %v541_v11  ;;  %v2019_v11 = vadd.s32 8, %v2014_v6 }
  0xb3   : > { %v576_v16 = vsel %vm569_vm1, %v1971_v14, 0.0  ;;  %v570_v17 = vsel %vm569_vm1, %v1974_v15, 0.0  ;;  %v593_v26 = vmul.f32 %v1974_v15, %v1974_v15  ;;  %v595_v30 = vmul.f32 %v1971_v14, %v1971_v14 }
  0xb4   : > { %577 = vadd.xlane.f32.xlu0 %v576_v16  ;;  %571 = vadd.xlane.f32.xlu2 %v570_v17  ;;  %v2022_v16 = vadd.s32 16, %v2014_v6  ;;  %v2025_v17 = vadd.s32 24, %v2014_v6 }
  0xb5   : > { %v597_v27 = vsel %vm569_vm1, %v593_v26, 0.0  ;;  %v603_v31 = vsel %vm569_vm1, %v595_v30, 0.0 }
  0xb6   : > { %v729_v37 = vand.u32 15, %v2025_v17 }
  0xb8   : > { %v1980_v20 = vpop.permute.xlu1 %562  ;;  %v1982_v21 = vpop.permute.xlu0 %552 }
  0xb9   : > { %v1985_v22 = vmul.f32 %v1980_v20, %v544_v18  ;;  %v1988_v23 = vmul.f32 %v1982_v21, %v542_v19 }
  0xbb   : > { %v579_v24 = vsel %vm569_vm1, %v1985_v22, 0.0  ;;  %v573_v25 = vsel %vm569_vm1, %v1988_v23, 0.0  ;;  %v594_v28 = vmul.f32 %v1988_v23, %v1988_v23  ;;  %v596_v32 = vmul.f32 %v1985_v22, %v1985_v22 }
  0xbc   : > { %580 = vadd.xlane.f32.xlu1 %v579_v24  ;;  %574 = vadd.xlane.f32.xlu2 %v573_v25 }
  0xbd   : > { %v600_v29 = vsel %vm569_vm1, %v594_v28, 0.0  ;;  %v606_v33 = vsel %vm569_vm1, %v596_v32, 0.0  ;;  %v715_v32 = vand.u32 15, %v2019_v11 }
  0xc4   : > { %598 = vadd.xlane.f32.xlu2 %v597_v27  ;;  %v1468_v27 = vld [vmem:[%s515_s28] ss:$0 sm:$0xff] }
  0xcc   : > { %601 = vadd.xlane.f32.xlu2 %v600_v29  ;;  %v708_v29 = vand.u32 15, %v2014_v6 }
  0xd4   : > { %604 = vadd.xlane.f32.xlu2 %v603_v31 }
  0xdc   : > { %607 = vadd.xlane.f32.xlu2 %v606_v33  ;;  %v722_v33 = vand.u32 15, %v2022_v16 }
 0x127   : > { %v572_v38 = vpop.xlane.xlu2 %571  ;;  %v578_v54 = vpop.xlane.xlu0 %577 }
 0x128   : > { %v589_v43 = vmul.f32 %v588_v42, %v572_v38  ;;  %v2010_v56 = vmul.f32 %v588_v42, %v578_v54 }
 0x12a   : > { %v613_v45 = vmul.f32 %v589_v43, %v589_v43  ;;  %v615_v59 = vmul.f32 %v2010_v56, %v2010_v56  ;;  %v625_v18 = vsub.f32 %v1974_v15, %v589_v43 }
 0x12f   : > { %v575_v41 = vpop.xlane.xlu2 %574  ;;  %v581_v1 = vpop.xlane.xlu1 %580 }
 0x130   : > { %v2006_v48 = vmul.f32 %v588_v42, %v575_v41  ;;  %v2016_v7 = vmul.f32 %v588_v42, %v581_v1 }
 0x132   : > { %v614_v52 = vmul.f32 %v2006_v48, %v2006_v48  ;;  %v616_v26 = vmul.f32 %v2016_v7, %v2016_v7 }
 0x137   : > { %v599_v44 = vpop.xlane.xlu2 %598 }
 0x138   : > { %v609_v46 = vmul.f32 %v599_v44, %v588_v42 }
 0x13a   : > { %v617_v47 = vsub.f32 %v609_v46, %v613_v45 }
 0x13c   : > { %v621_v49 = vmax.f32 %v617_v47, 0.0  ;;  %v626_v47 = vsub.f32 %v1988_v23, %v2006_v48  ;;  %v627_v48 = vsub.f32 %v1971_v14, %v2010_v56 }
 0x13e   : > { %v629_v50 = vadd.f32 1e-05, %v621_v49 }
 0x13f   : > { %v602_v51 = vpop.xlane.xlu2 %601 }
 0x140   : > { %1472 = vrsqrt.f32 %v629_v50  ;;  %v610_v53 = vmul.f32 %v602_v51, %v588_v42  ;;  %vm639_vm4 = vweird.f32 %v629_v50 }
 0x142   : > { %v618_v55 = vsub.f32 %v610_v53, %v614_v52 }
 0x144   : > { %v622_v57 = vmax.f32 %v618_v55, 0.0 }
 0x146   : > { %v1473_v58 = vpop.eup %1472  ;;  %v630_v60 = vadd.f32 1e-05, %v622_v57 }
 0x147   : > { %v634_v61 = vmul.f32 %v1473_v58, %v629_v50  ;;  %v605_v62 = vpop.xlane.xlu2 %604  ;;  %vm640_vm3 = vweird.f32 %v1473_v58 }
 0x148   : > { %1474 = vrsqrt.f32 %v630_v60  ;;  %v611_v63 = vmul.f32 %v605_v62, %v588_v42  ;;  %vm641_vm5 = vmor %vm639_vm4, %vm640_vm3  ;;  %vm649_vm7 = vweird.f32 %v630_v60 }
 0x149   : > { %v635_v0 = vmul.f32 %v1473_v58, %v634_v61 }
 0x14a   : > { %v619_v2 = vsub.f32 %v611_v63, %v615_v59 }
 0x14b   : > { %v636_v4 = vmul.f32 0.5, %v635_v0 }
 0x14c   : > { %v623_v5 = vmax.f32 %v619_v2, 0.0 }
 0x14d   : > { %v637_v8 = vsub.f32 1.5, %v636_v4  ;;  %v628_v4 = vsub.f32 %v1985_v22, %v2016_v7 }
 0x14e   : > { %v1475_v9 = vpop.eup %1474  ;;  %v631_v10 = vadd.f32 1e-05, %v623_v5 }
 0x14f   : > { %v638_v19 = vmul.f32 %v1473_v58, %v637_v8  ;;  %v644_v24 = vmul.f32 %v1475_v9, %v630_v60  ;;  %v608_v25 = vpop.xlane.xlu2 %607  ;;  %vm650_vm6 = vweird.f32 %v1475_v9 }
 0x150   : > { %1476 = vrsqrt.f32 %v631_v10  ;;  %v612_v28 = vmul.f32 %v608_v25, %v588_v42  ;;  %vm651_vm8 = vmor %vm649_vm7, %vm650_vm6  ;;  %vm659_vm10 = vweird.f32 %v631_v10 }
 0x151   : > { %v642_v30 = vsel %vm641_vm5, %v1473_v58, %v638_v19  ;;  %v645_v31 = vmul.f32 %v1475_v9, %v644_v24  ;;  %v1749_v19 = vmov 0.0   ;;  %v1753_v24 = vmov 0.0  }
 0x152   : > { %v673_v35 = vmul.f32 %v642_v30, %v625_v18  ;;  %v620_v36 = vsub.f32 %v612_v28, %v616_v26  ;;  %v1745_v18 = vmov 0.0  }
 0x153   : > { %v646_v38 = vmul.f32 0.5, %v645_v31 }
 0x154   : > { %v681_v39 = vmul.f32 %v1468_v27, %v673_v35  ;;  %v624_v40 = vmax.f32 %v620_v36, 0.0 }
 0x155   : > { %v647_v41 = vsub.f32 1.5, %v646_v38 }
 0x156   : > { %v1477_v42 = vpop.eup %1476  ;;  %v2041_v43 = vadd.f32 %v1469_v34, %v681_v39  ;;  %v632_v44 = vadd.f32 1e-05, %v624_v40 }
 0x157   : > { %v648_v45 = vmul.f32 %v1475_v9, %v647_v41  ;;  %v654_v46 = vmul.f32 %v1477_v42, %v631_v10  ;;  %vm660_vm9 = vweird.f32 %v1477_v42  ;;  %v1741_v10 = vmov 0.0  }
 0x158   : > { %695 = vst.msk [vmem:[#allocation2 + $0x10] sm:$0xff] %vm569_vm1, %v2041_v43  ;;  %1478 = vrsqrt.f32 %v632_v44  ;;  %vm661_vm11 = vmor %vm659_vm10, %vm660_vm9  ;;  %vm669_vm13 = vweird.f32 %v632_v44 }
 0x159   : > { %v652_v49 = vsel %vm651_vm8, %v1475_v9, %v648_v45  ;;  %v655_v50 = vmul.f32 %v1477_v42, %v654_v46 }
 0x15a   : > { %v674_v51 = vmul.f32 %v652_v49, %v626_v47 }
 0x15b   : > { %v656_v52 = vmul.f32 0.5, %v655_v50 }
 0x15c   : > { %v682_v53 = vmul.f32 %v1468_v27, %v674_v51 }
 0x15d   : > { %v657_v54 = vsub.f32 1.5, %v656_v52 }
 0x15e   : > { %v1479_v55 = vpop.eup %1478  ;;  %v2047_v57 = vadd.f32 %v1469_v34, %v682_v53 }
 0x15f   : > { %v658_v58 = vmul.f32 %v1477_v42, %v657_v54  ;;  %v664_v59 = vmul.f32 %v1479_v55, %v632_v44  ;;  %vm670_vm12 = vweird.f32 %v1479_v55 }
 0x160   : > { %696 = vst.msk [vmem:[#allocation2 + $0x18] sm:$0xff] %vm569_vm1, %v2047_v57  ;;  %vm671_vm14 = vmor %vm669_vm13, %vm670_vm12 }
 0x161   : > { %v662_v60 = vsel %vm661_vm11, %v1477_v42, %v658_v58  ;;  %v665_v61 = vmul.f32 %v1479_v55, %v664_v59 }
 0x162   : > { %v675_v62 = vmul.f32 %v662_v60, %v627_v48 }
 0x163   : > { %v666_v63 = vmul.f32 0.5, %v665_v61 }
 0x164   : > { %v683_v0 = vmul.f32 %v1468_v27, %v675_v62 }
 0x165   : > { %v667_v1 = vsub.f32 1.5, %v666_v63 }
 0x166   : > { %v2053_v2 = vadd.f32 %v1469_v34, %v683_v0 }
 0x167   : > { %v668_v3 = vmul.f32 %v1479_v55, %v667_v1 }
 0x168   : > { %697 = vst.msk [vmem:[#allocation2 + $0x20] sm:$0xff] %vm569_vm1, %v2053_v2 }
 0x169   : > { %v672_v56 = vsel %vm671_vm14, %v1479_v55, %v668_v3 }
 0x16a   : > { %v676_v5 = vmul.f32 %v672_v56, %v628_v4 }
 0x16c   : > { %v684_v8 = vmul.f32 %v1468_v27, %v676_v5 }
 0x16e   : > { %v692_v9 = vadd.f32 %v1469_v34, %v684_v8 }
 0x170   : > { %698 = vst.msk [vmem:[#allocation2 + $0x28] sm:$0xff] %vm569_vm1, %v692_v9 }
 0x171 LB: >> { %s762_s28 = scalar_lea.vmem %s1915_s8, %s1759_s25 [#allocation6]  ;;  %s764_s23 = ssub.s32 16, %s1759_s25  ;;  %v770_v7 = vstv %s1759_s25  ;;  %v1768_v30 = vmov 0.0   ;;  %s1759_s25 = sphi %s2060_s25, %s757_s25   ;;  %v1755_v24 = vphi %v1753_v24, %v1754_v24   ;;  %v1751_v19 = vphi %v1749_v19, %v1750_v19   ;;  %v1747_v18 = vphi %v1745_v18, %v1746_v18   ;;  %v1743_v10 = vphi %v1741_v10, %v1742_v10  }
 0x172   : >> { %vm771_vm15 = vcmp.ge.s32.totalorder %v708_v29, %v770_v7  ;;  %vm772_vm0 = vcmp.ge.s32.totalorder %v715_v32, %v770_v7  ;;  %vm773_vm2 = vcmp.ge.s32.totalorder %v722_v33, %v770_v7  ;;  %vm774_vm3 = vcmp.ge.s32.totalorder %v729_v37, %v770_v7  ;;  %v1480_v25 = vld [vmem:[%s762_s28] ss:$0 sm:$0xff]  ;;  %s765_s16 = scalar_lea.vmem [#allocation2], %s764_s23  ;;  %s757_s25 = sadd.s32 1, %s1759_s25  }
 0x173   : >> { %v1305_v31 = vsel %vm771_vm15, 1.0, %v1768_v30  ;;  %v1306_v34 = vsel %vm772_vm0, 1.0, %v1768_v30  ;;  %v1307_v35 = vsel %vm773_vm2, 1.0, %v1768_v30  ;;  %v1308_v38 = vsel %vm774_vm3, 1.0, %v1768_v30  ;;  %p754_p1 = scmp.ge.s32.totalorder %s757_s25, 16  }
 0x174   : > { %v1333_v53 = vld [vmem:[%s1949_s29 + $0x8] sm:$0xff] (%p754_p1)  ;;  %v1332_v55 = vld [vmem:[%s1949_s29] sm:$0xff] (%p754_p1)  ;;  %s1769_s18 = smov (%p754_p1), 96   ;;  %p1323_p2 = scmp.ne.s32.totalorder (%p754_p1), %s1731_s12, 1 }
 0x175   : > { %v1481_v54 = vld [vmem:[%s518_s20] ss:$0 sm:$0xff] (%p754_p1)  ;;  %878 = vmatpush.bf16.msra.mxu0 (%p754_p1), %v1333_v53  ;;  %1334 = vmatpush.bf16.msra.mxu1 (%p754_p1), %v1333_v53 }
 0x176   : > { %v800_v58 = vmul.f32 (%p754_p1), %v1481_v54, %v2041_v43  ;;  %v801_v59 = vmul.f32 (%p754_p1), %v1481_v54, %v2047_v57  ;;  %v802_v48 = vmul.f32 (%p754_p1), %v1481_v54, %v2053_v2  ;;  %v803_v60 = vmul.f32 (%p754_p1), %v1481_v54, %v692_v9 }
 0x177   : >> { %v766_v26 = vld [vmem:[%s765_s16] sm:$0xff]  ;;  %v767_v27 = vld [vmem:[%s765_s16 + $0x8] sm:$0xff]  ;;  %v768_v28 = vld [vmem:[%s765_s16 + $0x10] sm:$0xff] }
 0x178   : >> { %v769_v36 = vld [vmem:[%s765_s16 + $0x18] sm:$0xff]  ;;  %v784_v39 = vmul.f32 %v1480_v25, %v766_v26  ;;  %v785_v40 = vmul.f32 %v1480_v25, %v767_v27  ;;  %v786_v41 = vmul.f32 %v1480_v25, %v768_v28 }
 0x179   : >> { %v787_v42 = vmul.f32 %v1480_v25, %v769_v36  ;;  %879 = vmatpush.bf16.msra.mxu0 (%p754_p1), %v1332_v55  ;;  %1335 = vmatpush.bf16.msra.mxu1 (%p754_p1), %v1332_v55 }
 0x17a   : >> { %v788_v44 = vmul.f32 %v1305_v31, %v784_v39  ;;  %v789_v45 = vmul.f32 %v1306_v34, %v785_v40  ;;  %v790_v46 = vmul.f32 %v1307_v35, %v786_v41 }
 0x17b   : >> { %v791_v47 = vmul.f32 %v1308_v38, %v787_v42  ;;  %756 = sbr.rel (!%p754_p1) target bundleno = 369 (0x171), region = 155 }
 0x17c   : >> { %v792_v49 = vadd.f32 %v1755_v24, %v788_v44   ;;  %v793_v50 = vadd.f32 %v1751_v19, %v789_v45   ;;  %v794_v51 = vadd.f32 %v1747_v18, %v790_v46   ;;  %v1482_v45 = vld [vmem:[%s521_s19] ss:$0 sm:$0xff] (%p754_p1) }
 0x17d   : >> { %v795_v52 = vadd.f32 %v1743_v10, %v791_v47  }
 0x17e   : >> { %v1746_v18 = vmov %v794_v51   ;;  %v1750_v19 = vmov %v793_v50   ;;  %v1754_v24 = vmov %v792_v49   ;;  %v804_v61 = vadd.f32 (%p754_p1), %v800_v58, %v792_v49 }
 0x17f   : >> { %v1742_v10 = vmov %v795_v52   ;;  %v805_v6 = vadd.f32 (%p754_p1), %v801_v59, %v793_v50  ;;  %v806_v11 = vadd.f32 (%p754_p1), %v802_v48, %v794_v51  ;;  %v807_v16 = vadd.f32 (%p754_p1), %v803_v60, %v795_v52 }
 0x180   : > { %v808_v17 = vmul.f32 %v804_v61, %v804_v61 }
 0x181   : > { %v809_v29 = vmul.f32 %v805_v6, %v805_v6  ;;  %v810_v32 = vmul.f32 %v806_v11, %v806_v11  ;;  %v811_v33 = vmul.f32 %v807_v16, %v807_v16 }
 0x182   : > { %v812_v37 = vmul.f32 %v808_v17, %v804_v61 }
 0x183   : > { %v813_v62 = vmul.f32 %v809_v29, %v805_v6  ;;  %v814_v63 = vmul.f32 %v810_v32, %v806_v11  ;;  %v815_v0 = vmul.f32 %v811_v33, %v807_v16 }
 0x184   : > { %v816_v43 = vmul.f32 0.044715, %v812_v37 }
 0x185   : > { %v817_v1 = vmul.f32 0.044715, %v813_v62  ;;  %v818_v57 = vmul.f32 0.044715, %v814_v63  ;;  %v819_v3 = vmul.f32 0.044715, %v815_v0 }
 0x186   : > { %v820_v2 = vadd.f32 %v816_v43, %v804_v61 }
 0x187   : > { %v821_v4 = vadd.f32 %v817_v1, %v805_v6  ;;  %v822_v56 = vadd.f32 %v818_v57, %v806_v11  ;;  %v823_v5 = vadd.f32 %v819_v3, %v807_v16 }
 0x188   : > { %v824_v8 = vmul.f32 0.7978846, %v820_v2 }
 0x189   : > { %v825_v9 = vmul.f32 0.7978846, %v821_v4  ;;  %v826_v10 = vmul.f32 0.7978846, %v822_v56  ;;  %v827_v18 = vmul.f32 0.7978846, %v823_v5 }
 0x18a   : > { %1483 = vtanh.f32 %v824_v8 }
 0x18b   : > { %1485 = vtanh.f32 %v825_v9 }
 0x18c   : > { %1487 = vtanh.f32 %v826_v10 }
 0x18d   : > { %1489 = vtanh.f32 %v827_v18 }
 0x190   : > { %v1484_v19 = vpop.eup %1483 }
 0x191   : > { %v1486_v24 = vpop.eup %1485  ;;  %v832_v7 = vadd.f32 1.0, %v1484_v19 }
 0x192   : > { %v1488_v25 = vpop.eup %1487  ;;  %v833_v26 = vadd.f32 1.0, %v1486_v24 }
 0x193   : > { %v1490_v27 = vpop.eup %1489  ;;  %v836_v28 = vmul.f32 0.5, %v832_v7  ;;  %v834_v30 = vadd.f32 1.0, %v1488_v25 }
 0x194   : > { %v837_v31 = vmul.f32 0.5, %v833_v26  ;;  %v835_v34 = vadd.f32 1.0, %v1490_v27 }
 0x195   : > { %v840_v35 = vmul.f32 %v836_v28, %v804_v61  ;;  %v838_v36 = vmul.f32 0.5, %v834_v30 }
 0x196   : > { %v841_v38 = vmul.f32 %v837_v31, %v805_v6  ;;  %v839_v39 = vmul.f32 0.5, %v835_v34 }
 0x197   : > { %v842_v40 = vmul.f32 %v838_v36, %v806_v11 }
 0x198   : > { %v844_v41 = vpack.c.bf16 %v841_v38, %v840_v35  ;;  %v843_v42 = vmul.f32 %v839_v39, %v807_v16 }
 0x19a   : > { %1317 = vmatmul.msk.bf16.vlgmr.msra.gmra.mxu0 %vm569_vm1, %v844_v41  ;;  %v845_v44 = vpack.c.bf16 %v843_v42, %v842_v40 }
 0x19c   : > { %1318 = vmatmul.msk.bf16.vlgmr.msra.gmra.mxu1 %vm569_vm1, %v845_v44 }
 0x217   : > { %v881_v46 = vpop.f32.mrf.mxu0 }
 0x218   : > { %v2097_v47 = vadd.f32 %v1482_v45, %v881_v46 }
 0x219   : > { %v886_v49 = vpop.f32.mrf.mxu1 }
 0x21a   : > { %v1319_v50 = vmul.f32 -1.442695, %v2097_v47  ;;  %v2100_v51 = vadd.f32 %v1482_v45, %v886_v49 }
 0x21c   : > { %1491 = vpow2.f32 %v1319_v50  ;;  %v1321_v52 = vmul.f32 -1.442695, %v2100_v51 }
 0x21e   : > { %1493 = vpow2.f32 %v1321_v52 }
 0x21f   : > { %v883_v53 = vpop.f32.mrf.mxu0 }
 0x220   : > { %v2103_v54 = vadd.f32 %v1482_v45, %v883_v53 }
 0x221   : > { %v888_v55 = vpop.f32.mrf.mxu1 }
 0x222   : > { %v1492_v58 = vpop.eup %1491  ;;  %v1320_v59 = vmul.f32 -1.442695, %v2103_v54  ;;  %v2106_v48 = vadd.f32 %v1482_v45, %v888_v55 }
 0x223   : > { %v903_v60 = vadd.f32 1.0, %v1492_v58 }
 0x224   : > { %v1494_v61 = vpop.eup %1493  ;;  %1495 = vpow2.f32 %v1320_v59  ;;  %v1322_v6 = vmul.f32 -1.442695, %v2106_v48 }
 0x225   : > { %1497 = vrcp.f32 %v903_v60  ;;  %v905_v11 = vadd.f32 1.0, %v1494_v61  ;;  %v918_v43 = vand.u32 2147483648, %v903_v60  ;;  %v916_v3 = vand.u32 2147483647, %v903_v60 }
 0x226   : > { %1499 = vpow2.f32 %v1322_v6  ;;  %vm912_vm5 = vweird.f32 %v903_v60 }
 0x227   : > { %1501 = vrcp.f32 %v905_v11  ;;  %v948_v2 = vand.u32 2147483648, %v905_v11  ;;  %v946_v56 = vand.u32 2147483647, %v905_v11  ;;  %vm942_vm7 = vweird.f32 %v905_v11 }
 0x228   : > { %v919_v9 = vor.u32 1.1754944e-38, %v918_v43  ;;  %vm917_vm9 = vcmp.eq.f32.partialorder %v916_v3, 8.507059e+37 }
 0x229   : > { %v949_v7 = vor.u32 1.1754944e-38, %v948_v2  ;;  %vm947_vm11 = vcmp.eq.f32.partialorder %v946_v56, 8.507059e+37 }
 0x22a   : > { %v1496_v16 = vpop.eup %1495 }
 0x22b   : > { %v1498_v17 = vpop.eup %1497  ;;  %v904_v29 = vadd.f32 1.0, %v1496_v16 }
 0x22c   : > { %v1500_v32 = vpop.eup %1499  ;;  %v908_v33 = vmul.f32 %v1498_v17, %v903_v60  ;;  %vm913_vm4 = vweird.f32 %v1498_v17 }
 0x22d   : > { %v1502_v37 = vpop.eup %1501  ;;  %1503 = vrcp.f32 %v904_v29  ;;  %v906_v62 = vadd.f32 1.0, %v1500_v32  ;;  %vm914_vm8 = vmor %vm912_vm5, %vm913_vm4  ;;  %v933_v31 = vand.u32 2147483648, %v904_v29  ;;  %v931_v36 = vand.u32 2147483647, %v904_v29 }
 0x22e   : > { %v938_v63 = vmul.f32 %v1502_v37, %v905_v11  ;;  %v909_v0 = vsub.f32 1.0, %v908_v33  ;;  %vm943_vm6 = vweird.f32 %v1502_v37  ;;  %vm927_vm13 = vweird.f32 %v904_v29 }
 0x22f   : > { %1505 = vrcp.f32 %v906_v62  ;;  %vm944_vm10 = vmor %vm942_vm7, %vm943_vm6  ;;  %v963_v38 = vand.u32 2147483648, %v906_v62  ;;  %v961_v40 = vand.u32 2147483647, %v906_v62  ;;  %v934_v42 = vor.u32 1.1754944e-38, %v933_v31 }
 0x230   : > { %v939_v1 = vsub.f32 1.0, %v938_v63  ;;  %v910_v57 = vmul.f32 %v1498_v17, %v909_v0  ;;  %vm957_vm0 = vweird.f32 %v906_v62  ;;  %vm932_vm2 = vcmp.eq.f32.partialorder %v931_v36, 8.507059e+37 }
 0x231   : > { %v964_v46 = vor.u32 1.1754944e-38, %v963_v38  ;;  %vm962_vm4 = vcmp.eq.f32.partialorder %v961_v40, 8.507059e+37 }
 0x232   : > { %v940_v4 = vmul.f32 %v1502_v37, %v939_v1  ;;  %v911_v5 = vadd.f32 %v1498_v17, %v910_v57 }
 0x233   : > { %v1504_v8 = vpop.eup %1503 }
 0x234   : > { %v941_v10 = vadd.f32 %v1502_v37, %v940_v4  ;;  %v915_v18 = vsel %vm914_vm8, %v1498_v17, %v911_v5  ;;  %v923_v19 = vmul.f32 %v1504_v8, %v904_v29  ;;  %vm928_vm12 = vweird.f32 %v1504_v8 }
 0x235   : > { %v1506_v24 = vpop.eup %1505  ;;  %v920_v25 = vsel %vm917_vm9, %v919_v9, %v915_v18  ;;  %vm929_vm15 = vmor %vm927_vm13, %vm928_vm12 }
 0x236   : > { %v945_v26 = vsel %vm944_vm10, %v1502_v37, %v941_v10  ;;  %971 = vrot.lane.b32.xlu0 %v920_v25, %s1769_s18  ;;  %v953_v27 = vmul.f32 %v1506_v24, %v906_v62  ;;  %v924_v28 = vsub.f32 1.0, %v923_v19  ;;  %vm958_vm14 = vweird.f32 %v1506_v24 }
 0x237   : > { %v950_v30 = vsel %vm947_vm11, %v949_v7, %v945_v26  ;;  %vm959_vm3 = vmor %vm957_vm0, %vm958_vm14 }
 0x238   : > { %975 = vrot.lane.b32.xlu1 %v950_v30, %s1769_s18  ;;  %v954_v34 = vsub.f32 1.0, %v953_v27  ;;  %v925_v35 = vmul.f32 %v1504_v8, %v924_v28 }
 0x23a   : > { %v955_v39 = vmul.f32 %v1506_v24, %v954_v34  ;;  %v926_v41 = vadd.f32 %v1504_v8, %v925_v35 }
 0x23c   : > { %v956_v44 = vadd.f32 %v1506_v24, %v955_v39  ;;  %v930_v45 = vsel %vm929_vm15, %v1504_v8, %v926_v41 }
 0x23d   : > { %v935_v49 = vsel %vm932_vm2, %v934_v42, %v930_v45 }
 0x23e   : > { %v960_v50 = vsel %vm959_vm3, %v1506_v24, %v956_v44  ;;  %973 = vrot.lane.b32.xlu0 %v935_v49, %s1769_s18 }
 0x23f   : > { %v965_v52 = vsel %vm962_vm4, %v964_v46, %v960_v50 }
 0x240   : > { %977 = vrot.lane.b32.xlu1 %v965_v52, %s1769_s18 }
 0x2a8   : > { %v972_v53 = vpop.permute.xlu0 %971 }
 0x2a9   : > { %v983_v55 = vmul.f32 %v972_v53, %v2097_v47 }
 0x2aa   : > { %v976_v58 = vpop.permute.xlu1 %975 }
 0x2ab   : > { %v985_v59 = vmul.f32 %v976_v58, %v2100_v51  ;;  %v987_v60 = vadd.f32 %v983_v55, %v1974_v15 }
 0x2ad   : > { %v989_v61 = vadd.f32 %v985_v59, %v1971_v14  ;;  %991 = vst.msk [vmem:[#allocation9] sm:$0xff] %vm569_vm1, %v987_v60 }
 0x2af   : > { %993 = vst.msk [vmem:[#allocation9 + $0x10] sm:$0xff] %vm569_vm1, %v989_v61 }
 0x2b0   : > { %v974_v6 = vpop.permute.xlu0 %973 }
 0x2b1   : > { %v984_v11 = vmul.f32 %v974_v6, %v2103_v54 }
 0x2b2   : > { %v978_v16 = vpop.permute.xlu1 %977 }
 0x2b3   : > { %v986_v17 = vmul.f32 %v978_v16, %v2106_v48  ;;  %v988_v29 = vadd.f32 %v984_v11, %v1988_v23  ;;  %998 = sbr.rel (%p1323_p2) target bundleno = 733 (0x2dd), region = 79 }
 0x2b5   : > { %v990_v47 = vadd.f32 %v986_v17, %v1985_v22  ;;  %992 = vst.msk [vmem:[#allocation9 + $0x8] sm:$0xff] %vm569_vm1, %v988_v29 }
 0x2b7   : > { %994 = vst.msk [vmem:[#allocation9 + $0x18] sm:$0xff] %vm569_vm1, %v990_v47 }
 0x2b8   : > { %v999_v14 = vmul.f32 %v987_v60, %v1968_v13  ;;  %v1000_v15 = vmul.f32 %v988_v29, %v1982_v21  ;;  %v1001_v51 = vmul.f32 %v989_v61, %v1966_v12  ;;  %v1002_v54 = vmul.f32 %v990_v47, %v1980_v20 }
 0x2b9   : > { %v1021_v23 = vadd.f32 %v1982_v21, %v1968_v13  ;;  %v1028_v22 = vadd.f32 %v1980_v20, %v1966_v12  ;;  %vm1067_vm12 = vcmask 1041409   ;;  %vm1070_vm13 = vcmask 254976  }
 0x2ba   : > { %v1003_v48 = vsel %vm569_vm1, %v999_v14, 0.0  ;;  %v1004_v32 = vsel %vm569_vm1, %v1000_v15, 0.0  ;;  %v1012_v33 = vsel %vm569_vm1, %v1001_v51, 0.0  ;;  %v1013_v37 = vsel %vm569_vm1, %v1002_v54, 0.0 }
 0x2bb   : > { %v1005_v62 = vadd.f32 %v1004_v32, %v1003_v48  ;;  %v1014_v63 = vadd.f32 %v1013_v37, %v1012_v33  ;;  %v1022_v0 = vrot.slane %v1021_v23, 4  ;;  %v1029_v43 = vrot.slane %v1028_v22, 4 }
 0x2bd   : > { %v1023_v1 = vadd.f32 %v1022_v0, %v1021_v23  ;;  %v1030_v57 = vadd.f32 %v1029_v43, %v1028_v22  ;;  %v1006_v3 = vrot.slane %v1005_v62, 4  ;;  %v1015_v2 = vrot.slane %v1014_v63, 4 }
 0x2bf   : > { %v1024_v13 = vrot.slane %v1023_v1, 2  ;;  %v1031_v21 = vrot.slane %v1030_v57, 2  ;;  %v1007_v20 = vadd.f32 %v1006_v3, %v1005_v62  ;;  %v1016_v56 = vadd.f32 %v1015_v2, %v1014_v63 }
 0x2c1   : > { %v1025_v4 = vadd.f32 %v1024_v13, %v1023_v1  ;;  %v1032_v12 = vadd.f32 %v1031_v21, %v1030_v57  ;;  %v1008_v18 = vrot.slane %v1007_v20, 2  ;;  %v1017_v19 = vrot.slane %v1016_v56, 2 }
 0x2c3   : > { %v1026_v5 = vrot.slane %v1025_v4, 1  ;;  %v1033_v8 = vrot.slane %v1032_v12, 1  ;;  %v1009_v24 = vadd.f32 %v1008_v18, %v1007_v20  ;;  %v1018_v7 = vadd.f32 %v1017_v19, %v1016_v56 }
 0x2c5   : > { %v1027_v9 = vadd.f32 %v1026_v5, %v1025_v4  ;;  %v1034_v10 = vadd.f32 %v1033_v8, %v1032_v12  ;;  %v1010_v27 = vrot.slane %v1009_v24, 1  ;;  %v1019_v30 = vrot.slane %v1018_v7, 1 }
 0x2c7   : > { %1507 = vrcp.f32 %v1027_v9  ;;  %vm1040_vm1 = vweird.f32 %v1027_v9  ;;  %v1046_v31 = vand.u32 2147483648, %v1027_v9  ;;  %v1044_v36 = vand.u32 2147483647, %v1027_v9 }
 0x2c8   : > { %1509 = vrcp.f32 %v1034_v10  ;;  %v1061_v38 = vand.u32 2147483648, %v1034_v10  ;;  %vm1055_vm6 = vweird.f32 %v1034_v10  ;;  %v1059_v40 = vand.u32 2147483647, %v1034_v10 }
 0x2c9   : > { %v1047_v42 = vor.u32 1.1754944e-38, %v1046_v31  ;;  %v1011_v45 = vadd.f32 %v1010_v27, %v1009_v24  ;;  %vm1045_vm9 = vcmp.eq.f32.partialorder %v1044_v36, 8.507059e+37  ;;  %v1020_v50 = vadd.f32 %v1019_v30, %v1018_v7 }
 0x2ca   : > { %v1062_v49 = vor.u32 1.1754944e-38, %v1061_v38  ;;  %vm1060_vm11 = vcmp.eq.f32.partialorder %v1059_v40, 8.507059e+37 }
 0x2cd   : > { %v1508_v25 = vpop.eup %1507 }
 0x2ce   : > { %v1510_v26 = vpop.eup %1509  ;;  %v1036_v28 = vmul.f32 %v1508_v25, %v1027_v9  ;;  %vm1041_vm5 = vweird.f32 %v1508_v25 }
 0x2cf   : > { %v1051_v34 = vmul.f32 %v1510_v26, %v1034_v10  ;;  %vm1056_vm7 = vweird.f32 %v1510_v26  ;;  %vm1042_vm8 = vmor %vm1040_vm1, %vm1041_vm5 }
 0x2d0   : > { %v1037_v35 = vsub.f32 1.0, %v1036_v28  ;;  %vm1057_vm10 = vmor %vm1055_vm6, %vm1056_vm7 }
 0x2d1   : > { %v1052_v39 = vsub.f32 1.0, %v1051_v34 }
 0x2d2   : > { %v1038_v41 = vmul.f32 %v1508_v25, %v1037_v35 }
 0x2d3   : > { %v1053_v44 = vmul.f32 %v1510_v26, %v1052_v39 }
 0x2d4   : > { %v1039_v46 = vadd.f32 %v1508_v25, %v1038_v41 }
 0x2d5   : > { %v1054_v52 = vadd.f32 %v1510_v26, %v1053_v44 }
 0x2d6   : > { %v1043_v53 = vsel %vm1042_vm8, %v1508_v25, %v1039_v46 }
 0x2d7   : > { %v1048_v55 = vsel %vm1045_vm9, %v1047_v42, %v1043_v53  ;;  %v1058_v58 = vsel %vm1057_vm10, %v1510_v26, %v1054_v52 }
 0x2d8   : > { %v1049_v59 = vmul.f32 %v1048_v55, %v1011_v45  ;;  %v1063_v60 = vsel %vm1060_vm11, %v1062_v49, %v1058_v58 }
 0x2d9   : > { %v1064_v61 = vmul.f32 %v1063_v60, %v1020_v50 }
 0x2db   : > { %v1068_v6 = vsel %vm1067_vm12, %v1064_v61, %v1049_v59 }
 0x2dc   : > { %1071 = vst.msk [vmem:[#allocation10] sm:$0x3] %vm1070_vm13, %v1068_v6 }
 0x2dd PF: > { %p1361_p3 = scmp.eq.s32.totalorder %s1853_s15, 1  ;;  %s2193_s29 = sld [smem:[#allocation20_spill]] }
 0x2de   : > { %s1770_s24 = smov [#allocation9]   ;;  %s1771_s26 = smov 128  }
 0x2df   : > { %s1080_s17 = sshll.u32 %s1770_s24, 4  ;;  %s1772_s22 = smov 8   ;;  %s1081_s17 = int_to_ptr.vmem [resolvable:$true] %s1080_s17 }
 0x2e0   : > { %s1773_s21 = smov [#allocation10]   ;;  %s2194_s28 = sld [smem:[#allocation21_spill]] }
 0x2e1   : > { %s1097_s4 = sshll.u32 %s1773_s21, 4  ;;  %s1098_s4 = int_to_ptr.vmem [resolvable:$true] %s1097_s4 }
 0x2e3   : > { %s1082_s11 = sshll.u32 %s2193_s29, 4  ;;  %s1083_s11 = int_to_ptr.hbm [resolvable:$true] %s1082_s11 }
 0x2e4   : > { %1343 = dma.vmem_to_hbm [thread:$0]  (%p1361_p3), %s1081_s17, 512, %s1083_s11, [#allocation5], %s1771_s26, %s1771_s26, %s1772_s22  }
 0x2e6   : > { %s1099_s23 = sshll.u32 %s2194_s28, 4  ;;  %s1100_s23 = int_to_ptr.hbm [resolvable:$true] %s1099_s23 }
 0x2e7   : > { %1345 = dma.vmem_to_hbm [thread:$0]  (%p1361_p3), %s1098_s4, 32, %s1100_s23, [#allocation11]  }
 0x2e8   : > { %1710 = dma.done.wait (%p1361_p3), [#allocation5], 512  }
 0x2e9   : > { %1712 = vsyncadd (%p1361_p3), [#allocation5], 4294966784 }
 0x2ea   : > { %1714 = dma.done.wait (%p1361_p3), [#allocation11], 32  }
 0x2eb   : > { %1716 = vsyncadd (%p1361_p3), [#allocation11], 4294967264 }
 0x2ec PF: > { %s28_s14 = sadd.s32 1, %s1739_s14   ;;  %s2195_s16 = sld [smem:[#allocation16_spill]] }
 0x2ed   : > { %p25_p4 = scmp.ge.s32.totalorder %s28_s14, 4   ;;  %s2196_s11 = sld [smem:[#allocation18_spill]] }
 0x2ee   : > { %s2197_s9 = sld [smem:[#allocation17_spill]]  ;;  %s2198_s30 = smov %s1723_s10 }
 0x2ef   : > { %s2200_s12 = smov %s1735_s13 }
 0x2f0   :  { %27 = sbr.rel (!%p25_p4) target bundleno = 12 (0xc), region = 166 }
 0x2f2   : > { %s2199_s10 = smov %s2195_s16 }
 0x2f4   : > { %s2201_s13 = smov %s2197_s9 }
 0x2f5   :  { %1118 = vsyncpa [#allocation4], 1 }
 0x2f6   :  { %1120 = vsyncpa [#allocation4 + $0x1], 1 }
 0x2f7   :  { %1121 = vsyncpa [#allocation7], 1 }
 0x2f8   :  { %1123 = vsyncpa [#allocation7 + $0x1], 1 }
 0x2f9   :  { %1124 = vsyncpa [#allocation5], 1 }
 0x2fa   :  { %1126 = vsyncpa [#allocation5 + $0x1], 1 }
 0x2fb   :  { %1127 = vsyncpa [#allocation11], 1 }

</bundles_post_ra>
